<compile_context>
chip_gen: v7x
topology: tpu7x:2x2x1
jax: 0.10.0
libtpu: 0.0.40
codegen_flags: <defaults>
</compile_context>

<pallas_src>
import jax
import jax.numpy as jnp
from jax.experimental import pallas as pl
from jax.experimental.pallas import tpu as pltpu


def _round_up(x: int, m: int) -> int:
    return ((x + m - 1) // m) * m


def _device_kind() -> str:
    try:
        return jax.devices()[0].device_kind.lower()
    except Exception:
        return ""


def _pack_params(params, y0, T):
    """Fold affines, transpose to (features, batch) layout, and pack every
    weight/bias into ONE (rows, 128) f32 slab (single DMA, VMEM-resident).

    Row-band layout (all bands 8-row aligned, everything starts at lane 0):
      band k (k < n_mid) : hidden weight W_{k+2}^T  (n_nodes, n_nodes)
      out band           : output weight (W_out/100)^T  (n_out, n_nodes)
      vec band           : col 0 = (W1/T)^T, col 1 = b1^T, cols 2..1+n_mid = hidden
                           biases, col 2+n_mid = (b_out/100 + y0)^T (first n_out rows)
    """
    n_nodes = params[0][0].shape[1]
    n_out = params[-1][0].shape[1]
    n_mid = len(params) - 2

    w1t = (params[0][0] / T).T.astype(jnp.float32)                       # (n_nodes, 1)
    b1t = params[0][1].reshape(1, -1).T.astype(jnp.float32)              # (n_nodes, 1)
    wot = (params[-1][0] / 100.0).T.astype(jnp.float32)                  # (n_out, n_nodes)
    bot = (params[-1][1].reshape(1, -1) / 100.0 + y0).T.astype(jnp.float32)

    band = _round_up(n_nodes, 8)
    mid_rows = tuple(k * band for k in range(n_mid))
    out_row = n_mid * band
    vec_row = out_row + _round_up(n_out, 8)
    rows = _round_up(vec_row + n_nodes, 8)
    lanes = 128
    assert n_nodes <= lanes and (3 + n_mid) <= lanes

    slab = jnp.zeros((rows, lanes), jnp.float32)
    for j in range(n_mid):
        wt = params[1 + j][0].T.astype(jnp.float32)                      # (n_nodes, n_nodes)
        bt_ = params[1 + j][1].reshape(1, -1).T.astype(jnp.float32)      # (n_nodes, 1)
        slab = slab.at[mid_rows[j]:mid_rows[j] + n_nodes, 0:n_nodes].set(wt)
        slab = slab.at[vec_row:vec_row + n_nodes, 2 + j:3 + j].set(bt_)
    slab = slab.at[out_row:out_row + n_out, 0:n_nodes].set(wot)
    slab = slab.at[vec_row:vec_row + n_nodes, 0:1].set(w1t)
    slab = slab.at[vec_row:vec_row + n_nodes, 1:2].set(b1t)
    slab = slab.at[vec_row:vec_row + n_out, 2 + n_mid:3 + n_mid].set(bot)
    return slab, mid_rows, out_row, vec_row, n_nodes, n_out, n_mid


def _make_kernel(mid_rows, out_row, vec_row, n_nodes, n_out, n_mid,
                 mxu_dtype, tanh_dtype):
    """Build the fused 5-layer kernel; all layout metadata is static (closure)."""

    def kernel(t_ref, w_ref, o_ref):
        t = t_ref[...]                                            # (1, bt) f32

        def act(x_f32):
            # tanh in bf16 on v6e/v7x (halves EUP pressure), f32 elsewhere / exact mode.
            return jnp.tanh(x_f32.astype(tanh_dtype))

        # --- layer 1: K == 1 -> outer product on the VPU (never the MXU). 1/T folded.
        w1 = w_ref[vec_row:vec_row + n_nodes, 0:1]                # (n_nodes, 1) f32
        b1 = w_ref[vec_row:vec_row + n_nodes, 1:2]
        h = act(w1 * t + b1)                                      # (n_nodes, bt)

        # --- hidden layers on the MXU: bf16 operands, f32 accumulation.
        for j in range(n_mid):
            r = mid_rows[j]
            w = w_ref[r:r + n_nodes, 0:n_nodes].astype(mxu_dtype)
            b = w_ref[vec_row:vec_row + n_nodes, 2 + j:3 + j]     # f32
            h = act(jnp.dot(w, h.astype(mxu_dtype),
                            preferred_element_type=jnp.float32) + b)

        # --- output layer; /100 and +y0 already folded into the packed slab.
        wo = w_ref[out_row:out_row + n_out, 0:n_nodes].astype(mxu_dtype)
        bo = w_ref[vec_row:vec_row + n_out, 2 + n_mid:3 + n_mid]  # (n_out, 1) f32
        o_ref[...] = (jnp.dot(wo, h.astype(mxu_dtype),
                              preferred_element_type=jnp.float32)
                      + bo).astype(o_ref.dtype)

    return kernel


def pinn_forward(t, params, y0, T, *, block_b: int = 16384,
                 precision: str = "fast", batch_major: bool = True):
    """PINN forward pass.

    t:       (B, 1) float32
    params:  list of (W, b) with W: (n_in, n_out), b: (1, n_out)
    y0:      (2,) or (1, 2) float32
    precision: "fast" (bf16 MXU operands, bf16 tanh on v6e/v7x) or "exact" (all f32).
    batch_major: True -> (B, 2); False -> feature-major (2, B) (skips the transpose).
    """
    B = t.shape[0]
    y0 = jnp.asarray(y0, jnp.float32).reshape(1, -1)

    kind = _device_kind()
    if precision == "exact":
        mxu_dtype = jnp.float32
        tanh_dtype = jnp.float32
        # NOTE: f32 jnp.dot uses the backend default matmul precision; this matched the
        # reference to 1e-5 in testing.  Pass precision=HIGHEST here if exactness matters.
    else:
        mxu_dtype = jnp.bfloat16                                   # MXU is bf16-native on all gens
        tanh_dtype = (jnp.bfloat16
                      if any(s in kind for s in ("v6", "v7", "7x"))
                      else jnp.float32)                            # no bf16 EUP/VPU on <= v5e
    n_cores = 2 if any(s in kind for s in ("v7", "7x")) else 1     # v7x: 2 TensorCores/chip

    slab, mid_rows, out_row, vec_row, n_nodes, n_out, n_mid = _pack_params(params, y0, T)

    # --- lane-dense batch tiling: 128-aligned tile, minimal padding, and on v7x keep
    # --- at least 2*num_cores grid steps so both TensorCores get work.
    B128 = _round_up(B, 128)
    steps = pl.cdiv(B128, max(128, _round_up(block_b, 128)))
    if n_cores > 1 and B128 >= 2 * n_cores * 128:
        steps = max(steps, 2 * n_cores)
    bt = _round_up(pl.cdiv(B128, steps), 128)
    steps = pl.cdiv(B128, bt)
    B_pad = steps * bt

    t_t = jnp.pad(t.reshape(B).astype(jnp.float32),
                  (0, B_pad - B)).reshape(1, B_pad)                # (1, B_pad)

    kernel = _make_kernel(mid_rows, out_row, vec_row, n_nodes, n_out, n_mid,
                          mxu_dtype, tanh_dtype)

    out_t = pl.pallas_call(
        kernel,
        out_shape=jax.ShapeDtypeStruct((n_out, B_pad), jnp.float32),
        grid=(steps,),
        in_specs=[pl.BlockSpec((1, bt), lambda i: (0, i)),
                  # single packed weight slab, constant index_map -> VMEM-resident, 1 DMA
                  pl.BlockSpec(slab.shape, lambda i: (0, 0))],
        out_specs=pl.BlockSpec((n_out, bt), lambda i: (0, i)),
        compiler_params=pltpu.CompilerParams(
            dimension_semantics=("parallel",)),
    )(t_t, slab)

    if batch_major:
        # Keep this transpose inside the same jit as the kernel so XLA fuses/elides it.
        return out_t.T[:B]
    return out_t[:, :B]


def init_pinn_params(key, n_in=1, n_out=2, n_hidden=4, n_nodes=20):
    """Deterministic PyTorch-style (uniform +/- 1/sqrt(fan_in)) Linear init."""
    sizes = [n_in] + [n_nodes] * n_hidden + [n_out]
    params = []
    for fan_in, fan_out in zip(sizes[:-1], sizes[1:]):
        key, kw, kb = jax.random.split(key, 3)
        bound = 1.0 / jnp.sqrt(jnp.float32(fan_in))
        w = jax.random.uniform(kw, (fan_in, fan_out), jnp.float32, -bound, bound)
        b = jax.random.uniform(kb, (1, fan_out), jnp.float32, -bound, bound)
        params.append((w, b))
    return params


def reference_forward(t, params, y0, T):
    h = t / T
    for i, (w, b) in enumerate(params):
        h = h @ w + b
        if i < len(params) - 1:
            h = jnp.tanh(h)
    return h / 100.0 + y0


if __name__ == "__main__":
    T = 2.0
    batch = 8

    key = jax.random.PRNGKey(0)
    key, kt = jax.random.split(key)

    params = init_pinn_params(key, n_in=1, n_out=2, n_hidden=4, n_nodes=20)
    y0 = jnp.array([[0.0, 0.1]], dtype=jnp.float32)
    t = jax.random.uniform(kt, (batch, 1), jnp.float32, 0.0, T)

    fwd = jax.jit(pinn_forward,
                  static_argnames=("block_b", "precision", "batch_major"))

    out_fast = jax.block_until_ready(fwd(t, params, y0, T))
    out_exact = jax.block_until_ready(fwd(t, params, y0, T, precision="exact"))
    ref = jax.block_until_ready(reference_forward(t, params, y0, T))

    assert out_fast.shape == (batch, 2)
    assert out_exact.shape == (batch, 2)
    # f32 "exact" mode keeps tight parity with the reference.
    assert jnp.allclose(out_exact, ref, atol=1e-5, rtol=1e-5)
    # bf16 fast path: relaxed tolerance (bf16 MXU operands / bf16 tanh on v6e+).
    assert jnp.allclose(out_fast, ref, atol=5e-3, rtol=5e-3)

    print("KERNEL_OK")
</pallas_src>

<mosaic_0001>
module attributes {stable_mosaic.version = 11 : i64} {
  func.func @kernel(%arg0: i32, %arg1: memref<1x128xf32, #tpu.memory_space<vmem>>, %arg2: memref<104x128xf32, #tpu.memory_space<vmem>>, %arg3: memref<2x128xf32, #tpu.memory_space<vmem>>) attributes {dimension_semantics = [#tpu.dimension_semantics<parallel>], iteration_bounds = array<i64: 1>, scalar_prefetch = 0 : i64, scratch_operands = 0 : i64, tpu.core_type = #tpu.core_type<tc>, window_params = [{transform_indices = @transform_0, window_bounds = array<i64: 1, 128>}, {pipeline_mode = #tpu.pipeline_mode<synchronous>, transform_indices = @transform_1, window_bounds = array<i64: 104, 128>}, {transform_indices = @transform_2, window_bounds = array<i64: 2, 128>}]} {
    %c0 = arith.constant 0 : index
    %c0_0 = arith.constant 0 : index
    %0 = vector.load %arg1[%c0, %c0_0] : memref<1x128xf32, #tpu.memory_space<vmem>>, vector<1x128xf32>
    %c80 = arith.constant 80 : index
    %c0_1 = arith.constant 0 : index
    %1 = vector.load %arg2[%c80, %c0_1] : memref<104x128xf32, #tpu.memory_space<vmem>>, vector<20x1xf32>
    %c80_2 = arith.constant 80 : index
    %c1 = arith.constant 1 : index
    %2 = vector.load %arg2[%c80_2, %c1] : memref<104x128xf32, #tpu.memory_space<vmem>>, vector<20x1xf32>
    %3 = vector.broadcast %1 : vector<20x1xf32> to vector<20x128xf32>
    %4 = vector.broadcast %0 : vector<1x128xf32> to vector<20x128xf32>
    %5 = arith.mulf %3, %4 : vector<20x128xf32>
    %6 = vector.broadcast %2 : vector<20x1xf32> to vector<20x128xf32>
    %7 = arith.addf %5, %6 : vector<20x128xf32>
    %8 = math.tanh %7 : vector<20x128xf32>
    %c0_3 = arith.constant 0 : index
    %c0_4 = arith.constant 0 : index
    %9 = vector.load %arg2[%c0_3, %c0_4] : memref<104x128xf32, #tpu.memory_space<vmem>>, vector<20x20xf32>
    %10 = arith.truncf %9 : vector<20x20xf32> to vector<20x20xbf16>
    %c80_5 = arith.constant 80 : index
    %c2 = arith.constant 2 : index
    %11 = vector.load %arg2[%c80_5, %c2] : memref<104x128xf32, #tpu.memory_space<vmem>>, vector<20x1xf32>
    %12 = arith.truncf %8 : vector<20x128xf32> to vector<20x128xbf16>
    %cst = arith.constant dense<0.000000e+00> : vector<20x128xf32>
    %13 = tpu.matmul %10, %12, %cst {dimension_numbers = #tpu.dot_dimension_numbers<[1], [0], [0], [1], [0, 0, 1, 1], [], []>} : vector<20x20xbf16>, vector<20x128xbf16>, vector<20x128xf32> -> vector<20x128xf32>
    %14 = vector.broadcast %11 : vector<20x1xf32> to vector<20x128xf32>
    %15 = arith.addf %13, %14 : vector<20x128xf32>
    %16 = math.tanh %15 : vector<20x128xf32>
    %c24 = arith.constant 24 : index
    %c0_6 = arith.constant 0 : index
    %17 = vector.load %arg2[%c24, %c0_6] : memref<104x128xf32, #tpu.memory_space<vmem>>, vector<20x20xf32>
    %18 = arith.truncf %17 : vector<20x20xf32> to vector<20x20xbf16>
    %c80_7 = arith.constant 80 : index
    %c3 = arith.constant 3 : index
    %19 = vector.load %arg2[%c80_7, %c3] : memref<104x128xf32, #tpu.memory_space<vmem>>, vector<20x1xf32>
    %20 = arith.truncf %16 : vector<20x128xf32> to vector<20x128xbf16>
    %cst_8 = arith.constant dense<0.000000e+00> : vector<20x128xf32>
    %21 = tpu.matmul %18, %20, %cst_8 {dimension_numbers = #tpu.dot_dimension_numbers<[1], [0], [0], [1], [0, 0, 1, 1], [], []>} : vector<20x20xbf16>, vector<20x128xbf16>, vector<20x128xf32> -> vector<20x128xf32>
    %22 = vector.broadcast %19 : vector<20x1xf32> to vector<20x128xf32>
    %23 = arith.addf %21, %22 : vector<20x128xf32>
    %24 = math.tanh %23 : vector<20x128xf32>
    %c48 = arith.constant 48 : index
    %c0_9 = arith.constant 0 : index
    %25 = vector.load %arg2[%c48, %c0_9] : memref<104x128xf32, #tpu.memory_space<vmem>>, vector<20x20xf32>
    %26 = arith.truncf %25 : vector<20x20xf32> to vector<20x20xbf16>
    %c80_10 = arith.constant 80 : index
    %c4 = arith.constant 4 : index
    %27 = vector.load %arg2[%c80_10, %c4] : memref<104x128xf32, #tpu.memory_space<vmem>>, vector<20x1xf32>
    %28 = arith.truncf %24 : vector<20x128xf32> to vector<20x128xbf16>
    %cst_11 = arith.constant dense<0.000000e+00> : vector<20x128xf32>
    %29 = tpu.matmul %26, %28, %cst_11 {dimension_numbers = #tpu.dot_dimension_numbers<[1], [0], [0], [1], [0, 0, 1, 1], [], []>} : vector<20x20xbf16>, vector<20x128xbf16>, vector<20x128xf32> -> vector<20x128xf32>
    %30 = vector.broadcast %27 : vector<20x1xf32> to vector<20x128xf32>
    %31 = arith.addf %29, %30 : vector<20x128xf32>
    %32 = math.tanh %31 : vector<20x128xf32>
    %c72 = arith.constant 72 : index
    %c0_12 = arith.constant 0 : index
    %33 = vector.load %arg2[%c72, %c0_12] : memref<104x128xf32, #tpu.memory_space<vmem>>, vector<2x20xf32>
    %34 = arith.truncf %33 : vector<2x20xf32> to vector<2x20xbf16>
    %c80_13 = arith.constant 80 : index
    %c5 = arith.constant 5 : index
    %35 = vector.load %arg2[%c80_13, %c5] : memref<104x128xf32, #tpu.memory_space<vmem>>, vector<2x1xf32>
    %36 = arith.truncf %32 : vector<20x128xf32> to vector<20x128xbf16>
    %cst_14 = arith.constant dense<0.000000e+00> : vector<2x128xf32>
    %37 = tpu.matmul %34, %36, %cst_14 {dimension_numbers = #tpu.dot_dimension_numbers<[1], [0], [0], [1], [0, 0, 1, 1], [], []>} : vector<2x20xbf16>, vector<20x128xbf16>, vector<2x128xf32> -> vector<2x128xf32>
    %38 = vector.broadcast %35 : vector<2x1xf32> to vector<2x128xf32>
    %39 = arith.addf %37, %38 : vector<2x128xf32>
    %c0_15 = arith.constant 0 : index
    %c0_16 = arith.constant 0 : index
    %40 = vector.load %arg3[%c0_15, %c0_16] : memref<2x128xf32, #tpu.memory_space<vmem>>, vector<2x128xf32>
    tpu.vector_store %arg3[%c0_15, %c0_16], %39 {strides = array<i32>} : memref<2x128xf32, #tpu.memory_space<vmem>>, vector<2x128xf32>,
    return
  }
  func.func @transform_0(%arg0: i32) -> (i32, i32) {
    %c0_i32 = arith.constant 0 : i32
    %c0_i32_0 = arith.constant 0 : i32
    return %c0_i32, %arg0 : i32, i32
  }
  func.func @transform_1(%arg0: i32) -> (i32, i32) {
    %c0_i32 = arith.constant 0 : i32
    %c0_i32_0 = arith.constant 0 : i32
    %c0_i32_1 = arith.constant 0 : i32
    return %c0_i32, %c0_i32_0 : i32, i32
  }
  func.func @transform_2(%arg0: i32) -> (i32, i32) {
    %c0_i32 = arith.constant 0 : i32
    %c0_i32_0 = arith.constant 0 : i32
    return %c0_i32, %arg0 : i32, i32
  }
}

</mosaic_0001>

<bundles_post_ra>
// kernel: pinn_forward.1
= control target key start
LH: loop header
LB: loop body
LE: loop exit
PB: predicated region body
PF: predicated region fallthrough
CT: control target
= control target key end

     0   :  { %v493_v1 = vmov 1   ;;  %v494_v2 = vmov 0   ;;  %s609_s0 = inlined_call_operand.vmem [shape: f32[1,128], index: 0, kind: input, shape index: {}]   ;;  %s610_s1 = inlined_call_operand.vmem [shape: f32[104,128], index: 1, kind: input, shape index: {}]   ;;  %s611_s2 = inlined_call_operand.hbm [shape: f32[2,128], index: 2, kind: output, shape index: {}]  }
   0x1   :  { %v520_v0 = vld [vmem:[%s610_s1 + $0x50] sm:$0xff]  ;;  %437 = vset.pattern.permute.xlu1 %v493_v1  ;;  %436 = vset.pattern.permute.xlu0 %v494_v2 }
   0x2   :  { %7 = vsyncpa [#allocation3], 0  ;;  %42 = vperm.xlu1 %437, %v520_v0   ;;  %19 = vperm.xlu0 %436, %v520_v0   ;;  %v527_v3 = vld [vmem:[%s610_s1 + $0x58] sm:$0xff]  ;;  %v534_v4 = vld [vmem:[%s610_s1 + $0x60] sm:$0xf]  ;;  %vm78_vm0 = vcmask 162816  }
   0x3   :  { %v59_v5 = vld [vmem:[%s610_s1] sm:$0xff]  ;;  %v60_v6 = vld [vmem:[%s610_s1 + $0x8] sm:$0xff]  ;;  %v495_v8 = vmov 2   ;;  %vm85_vm1 = vcmask 1041408   ;;  %v61_v26 = vld [vmem:[%s610_s1 + $0x10] sm:$0xf] }
   0x4   :  { %v62_v7 = vpack.c.bf16 %v60_v6, %v59_v5  ;;  %v369_v9 = vld [vmem:[%s609_s0] ss:$0 sm:$0xff]  ;;  %v63_v29 = vpack.c.bf16 %v61_v26, %v61_v26  ;;  %v140_v30 = vld [vmem:[%s610_s1 + $0x18] sm:$0xff]  ;;  %v496_v33 = vmov 3   ;;  %v142_v49 = vld [vmem:[%s610_s1 + $0x28] sm:$0xf] }
   0x5   :  { %v141_v31 = vld [vmem:[%s610_s1 + $0x20] sm:$0xff]  ;;  %v144_v51 = vpack.c.bf16 %v142_v49, %v142_v49  ;;  %v219_v52 = vld [vmem:[%s610_s1 + $0x30] sm:$0xff]  ;;  %v220_v53 = vld [vmem:[%s610_s1 + $0x38] sm:$0xff]  ;;  %v497_v55 = vmov 4   ;;  %vm499_vm2 = vmmov 0   ;;  %s501_s10 = smov [#allocation2]  }
   0x6   :  { %46 = vperm.xlu1 %437, %v527_v3   ;;  %24 = vperm.xlu0 %436, %v527_v3   ;;  %v143_v32 = vpack.c.bf16 %v141_v31, %v140_v30  ;;  %v222_v54 = vpack.c.bf16 %v220_v53, %v219_v52  ;;  %s361_s11 = sshll.u32 %s501_s10, 4  ;;  %s362_s11 = int_to_ptr.vmem [resolvable:$true] %s361_s11 }
   0x7   :  { %396 = vmatprep.mubr.msk.bf16.mxu0 %vm78_vm0, %v62_v7  ;;  %s469_s12 = scalar_lea.vmem %s362_s11, 32  ;;  %p474_p1 = scmp.lt.s32.totalorder %s362_s11, %s362_s11 }
   0x8   :  { %404 = vmatprep.mubr.msk.bf16.mxu1 %vm78_vm0, %v143_v32  ;;  %p470_p0 = scmp.ne.s32.totalorder %s362_s11, %s469_s12  ;;  %p475_p2 = scmp.lt.s32.totalorder %s469_s12, %s469_s12 }
   0xa   :  { %50 = vperm.xlu1 %437, %v534_v4   ;;  %29 = vperm.xlu0 %436, %v534_v4   ;;  %p476_p3 = por %p475_p2, %p474_p1 }
   0xc   :  { %p477_p4 = pnand %p476_p3, %p470_p0 }
   0xe   :  { %439 = vset.pattern.permute.xlu1 %v495_v8  ;;  %438 = vset.pattern.permute.xlu0 %v495_v8 }
   0xf   :  { %71 = vperm.xlu1 %439, %v527_v3   ;;  %67 = vperm.xlu0 %438, %v520_v0  }
  0x13   :  { %75 = vperm.xlu1 %439, %v534_v4   ;;  %440 = vset.pattern.permute.xlu0 %v496_v33 }
  0x14   :  { %148 = vperm.xlu0 %440, %v520_v0  }
  0x17   :  { %441 = vset.pattern.permute.xlu1 %v496_v33 }
  0x18   :  { %152 = vperm.xlu1 %441, %v527_v3   ;;  %442 = vset.pattern.permute.xlu0 %v497_v55 }
  0x19   :  { %227 = vperm.xlu0 %442, %v520_v0  }
  0x1c   :  { %156 = vperm.xlu1 %441, %v534_v4  }
  0x20   :  { %443 = vset.pattern.permute.xlu1 %v497_v55 }
  0x21   :  { %231 = vperm.xlu1 %443, %v527_v3  }
  0x25   :  { %235 = vperm.xlu1 %443, %v534_v4   ;;  %v221_v4 = vld [vmem:[%s610_s1 + $0x40] sm:$0xf] }
  0x81   :  { %v43_v10 = vpop.permute.xlu1 %42  ;;  %v20_v11 = vpop.permute.xlu0 %19 }
  0x82   :  { %v38_v12 = vmul.f32 %v369_v9, %v20_v11  ;;  %v300_v11 = vld [vmem:[%s610_s1 + $0x50] sm:$0x3] }
  0x84   :  { %v53_v13 = vadd.f32 %v43_v10, %v38_v12  ;;  %v498_v10 = vmov 0.0   ;;  %v500_v12 = vmov 5  }
  0x85   :  { %v47_v14 = vpop.permute.xlu1 %46  ;;  %v25_v15 = vpop.permute.xlu0 %24  ;;  %444 = vset.pattern.permute.xlu0 %v500_v12 }
  0x86   :  { %v39_v16 = vmul.f32 %v369_v9, %v25_v15  ;;  %445 = vtanh.f32 %v53_v13  ;;  %305 = vperm.xlu0 %444, %v300_v11  }
  0x88   :  { %v54_v17 = vadd.f32 %v47_v14, %v39_v16 }
  0x89   :  { %v30_v18 = vpop.permute.xlu0 %29  ;;  %v51_v20 = vpop.permute.xlu1 %50 }
  0x8a   :  { %447 = vtanh.f32 %v54_v17  ;;  %v40_v19 = vmul.f32 %v369_v9, %v30_v18  ;;  %v223_v9 = vpack.c.bf16 %v221_v4, %v221_v4 }
  0x8c   :  { %v55_v21 = vadd.f32 %v51_v20, %v40_v19 }
  0x8e   :  { %449 = vtanh.f32 %v55_v21  ;;  %v72_v34 = vpop.permute.xlu1 %71  ;;  %v68_v36 = vpop.permute.xlu0 %67 }
  0x90   :  { %v446_v22 = vpop.eup %445 }
  0x92   :  { %v76_v35 = vpop.permute.xlu1 %75 }
  0x93   :  { %v149_v58 = vpop.permute.xlu0 %148 }
  0x94   :  { %v448_v23 = vpop.eup %447 }
  0x95   :  { %v64_v24 = vpack.c.bf16 %v448_v23, %v446_v22 }
  0x97   :  { %392 = vmatprep.subr.bf16.mxu0 %v64_v24  ;;  %v153_v56 = vpop.permute.xlu1 %152 }
  0x98   :  { %v450_v25 = vpop.eup %449  ;;  %393 = vmatpush3.bf16.msra.mxu0 %v64_v24  ;;  %v228_v15 = vpop.permute.xlu0 %227 }
  0x99   :  { %v65_v27 = vpack.c.bf16 %v450_v25, %v450_v25 }
  0x9b   :  { %424 = vmatprep.subr.msk.bf16.mxu0 %vm85_vm1, %v65_v27  ;;  %v87_v28 = vsel %vm85_vm1, %v65_v27, 0  ;;  %v157_v57 = vpop.permute.xlu1 %156 }
  0x9c   :  { %395 = vmatpush3.bf16.msra.mxu0 %v87_v28  ;;  %v298_v28 = vld [vmem:[%s610_s1 + $0x48] sm:$0x3] }
  0x9d   :  { %v299_v30 = vpack.c.bf16 %v298_v28, %v298_v28 }
  0x9f   :  { %397 = vmatmul.mubr.msk.bf16.vlgmr.msra.gmra.mrb[0].mxu0 %vm78_vm0, %v63_v29 }
  0xa0   :  { %412 = vmatprep.mubr.msk.bf16.mxu0 %vm78_vm0, %v222_v54  ;;  %v232_v13 = vpop.permute.xlu1 %231 }
  0xa4   :  { %v236_v14 = vpop.permute.xlu1 %235 }
 0x105   :  { %v306_v31 = vpop.permute.xlu0 %305 }
 0x172   :  { %v398_v37 = vpop.f32.mrb[0].mxu0 }
 0x173   :  { %v132_v38 = vadd.f32 %v398_v37, %v76_v35  ;;  %v123_v39 = vpop.f32.mrb[1].mxu0 }
 0x174   :  { %v124_v40 = vadd.f32 %v123_v39, %v68_v36  ;;  %v399_v41 = vpop.f32.mrb[2].mxu0 }
 0x175   :  { %v126_v42 = vpop.f32.mrb[3].mxu0  ;;  %451 = vtanh.f32 %v132_v38 }
 0x176   :  { %v127_v43 = vadd.f32 %v126_v42, %v72_v34  ;;  %453 = vtanh.f32 %v124_v40 }
 0x178   :  { %455 = vtanh.f32 %v127_v43 }
 0x17f   :  { %v452_v44 = vpop.eup %451 }
 0x180   :  { %v454_v45 = vpop.eup %453  ;;  %v146_v48 = vpack.c.bf16 %v452_v44, %v452_v44 }
 0x182   :  { %v456_v46 = vpop.eup %455  ;;  %v166_v50 = vsel %vm85_vm1, %v146_v48, 0 }
 0x183   :  { %v145_v47 = vpack.c.bf16 %v456_v46, %v454_v45 }
 0x185   :  { %400 = vmatprep.subr.bf16.mxu1 %v145_v47 }
 0x186   :  { %401 = vmatpush3.bf16.msra.mxu1 %v145_v47 }
 0x187   :  { %425 = vmatprep.subr.msk.bf16.mxu1 %vm85_vm1, %v146_v48 }
 0x18a   :  { %403 = vmatpush3.bf16.msra.mxu1 %v166_v50 }
 0x18b   :  { %416 = vmatprep.subr.bf16.mxu1 %v498_v10 }
 0x18d   :  { %405 = vmatmul.mubr.msk.bf16.vlgmr.msra.gmra.mrb[0].mxu1 %vm78_vm0, %v144_v51 }
 0x18e   :  { %420 = vmatprep.mubr.msk.bf16.mxu1 %vm499_vm2, %v498_v10 }
 0x260   :  { %v406_v59 = vpop.f32.mrb[0].mxu1 }
 0x261   :  { %v211_v60 = vadd.f32 %v406_v59, %v157_v57  ;;  %v202_v61 = vpop.f32.mrb[1].mxu1 }
 0x262   :  { %v203_v62 = vadd.f32 %v202_v61, %v149_v58  ;;  %v407_v63 = vpop.f32.mrb[2].mxu1 }
 0x263   :  { %v205_v1 = vpop.f32.mrb[3].mxu1  ;;  %457 = vtanh.f32 %v211_v60 }
 0x264   :  { %v206_v2 = vadd.f32 %v205_v1, %v153_v56  ;;  %459 = vtanh.f32 %v203_v62 }
 0x266   :  { %461 = vtanh.f32 %v206_v2 }
 0x26d   :  { %v458_v5 = vpop.eup %457 }
 0x26e   :  { %v460_v6 = vpop.eup %459  ;;  %v225_v0 = vpack.c.bf16 %v458_v5, %v458_v5 }
 0x270   :  { %v462_v3 = vpop.eup %461  ;;  %v245_v8 = vsel %vm85_vm1, %v225_v0, 0 }
 0x271   :  { %v224_v7 = vpack.c.bf16 %v462_v3, %v460_v6 }
 0x273   :  { %408 = vmatprep.subr.bf16.mxu0 %v224_v7 }
 0x274   :  { %409 = vmatpush3.bf16.msra.mxu0 %v224_v7 }
 0x275   :  { %426 = vmatprep.subr.msk.bf16.mxu0 %vm85_vm1, %v225_v0 }
 0x278   :  { %411 = vmatpush3.bf16.msra.mxu0 %v245_v8 }
 0x27b   :  { %413 = vmatmul.mubr.msk.bf16.vlgmr.msra.gmra.mrb[4].mxu0 %vm78_vm0, %v223_v9 }
 0x34e   :  { %v414_v16 = vpop.f32.mrb[4].mxu0 }
 0x34f   :  { %v290_v17 = vadd.f32 %v414_v16, %v236_v14  ;;  %v281_v18 = vpop.f32.mrb[5].mxu0 }
 0x350   :  { %v282_v19 = vadd.f32 %v281_v18, %v228_v15  ;;  %v415_v20 = vpop.f32.mrb[6].mxu0 }
 0x351   :  { %v284_v21 = vpop.f32.mrb[7].mxu0  ;;  %463 = vtanh.f32 %v290_v17 }
 0x352   :  { %v285_v22 = vadd.f32 %v284_v21, %v232_v13  ;;  %465 = vtanh.f32 %v282_v19 }
 0x354   :  { %467 = vtanh.f32 %v285_v22 }
 0x35b   :  { %v464_v23 = vpop.eup %463 }
 0x35c   :  { %v466_v24 = vpop.eup %465  ;;  %v302_v27 = vpack.c.bf16 %v464_v23, %v464_v23 }
 0x35e   :  { %v468_v25 = vpop.eup %467  ;;  %v312_v29 = vsel %vm85_vm1, %v302_v27, 0 }
 0x35f   :  { %v301_v26 = vpack.c.bf16 %v468_v25, %v466_v24 }
 0x361   :  { %417 = vmatpush3.bf16.msra.mxu1 %v301_v26 }
 0x362   :  { %418 = vmatprep.subr.bf16.mxu1 %v498_v10 }
 0x365   :  { %419 = vmatpush3.bf16.msra.mxu1 %v312_v29 }
 0x368   :  { %421 = vmatmul.mubr.msk.bf16.vlgmr.msra.gmra.mrb[4].mxu1 %vm78_vm0, %v299_v30 }
 0x43b   :  { %v348_v32 = vpop.f32.mrb[4].mxu1 }
 0x43c   :  { %v349_v33 = vadd.f32 %v348_v32, %v306_v31  ;;  %v422_v34 = vpop.f32.mrb[5].mxu1 }
 0x43d   :  { %v351_v35 = vpop.f32.mrb[6].mxu1 }
 0x43e   :  { %354 = vst [vmem:[#allocation2] sm:$0x3] %v349_v33  ;;  %v423_v36 = vpop.f32.mrb[7].mxu1 }
 0x43f   :  { %480 = shalt.err (!%p477_p4)
}
 0x440   :  { %s481_s14 = scalar_lea.hbm %s611_s2, 32 }
 0x441   :  { %p482_p5 = scmp.ne.s32.totalorder %s611_s2, %s481_s14  ;;  %p485_p6 = scmp.lt.u32.totalorder %s481_s14, %s611_s2 }
 0x443   :  { %p487_p7 = pnand %p485_p6, %p482_p5 }
 0x445   :  { %490 = shalt.err (!%p487_p7)
}
 0x446   :  { %364 = dma.vmem_to_hbm [thread:$0]  %s362_s11, 32, %s611_s2, [#allocation3]  }
 0x447   :  { %491 = dma.done.wait [#allocation3], 32  }
 0x448   :  { %492 = vsyncadd [#allocation3], 4294967264 }
 0x449   :  { %368 = vsyncpa [#allocation3], 1 }

</bundles_post_ra>
